<compile_context>
chip_gen: v5e
topology: v5e:2x2
jax: 0.10.0
libtpu: 0.0.40
codegen_flags: <defaults>
</compile_context>

<pallas_src>
import jax
import jax.numpy as jnp
from jax.experimental import pallas as pl
from jax.experimental.pallas import tpu as pltpu  # noqa: F401  (TPU backend)

NUM_QUBITS = 4                    # qnn.circuit.num_qubits
LATENT_DIM = 3
LATENT_PAD = 4                    # latent padded to 4 lanes
HID1 = 8
HID2 = 7                          # real second hidden width (padded to 8 in the slab)
BATCH = 8
NUM_OUTCOMES = 2 ** NUM_QUBITS    # SamplerQNN-style output size

# packed input layout: xe = [ x (4) | eps (3) | 0 (1) ]  -> (B, 8)
XE_COLS = NUM_QUBITS + LATENT_PAD            # 8

# packed parameter slab (36, 8): four row-aligned weight blocks + bias rows
W1_R, W2_R, WH_R, WP_R = 0, 8, 16, 24        # weight block start rows
B1_R, B2_R, BH_R, BP_R = 32, 33, 34, 35      # bias rows
P_ROWS, P_COLS = 36, 8

# packed output layout: [ enc (4) | z_mean (4) | z_log_var (4) | decoded (16) ] -> (B, 28)
ENC_OFF, ZM_OFF, ZLV_OFF, DEC_OFF = 0, 4, 8, 12
OUT_COLS = DEC_OFF + NUM_OUTCOMES            # 28


def qevae_kernel(xe_ref, p_ref, out_ref):
    xe = xe_ref[...]                                    # (B, 8) = x | eps_pad
    eps = xe[:, NUM_QUBITS:XE_COLS]                     # (B, 4); col 3 is zero pad

    # ---- encoder: Linear(4, 8) -> LeakyReLU(0.01) -> Linear(8, 7) -> LeakyReLU(0.01)
    # W1 block rows 4..7 are zero, so the eps columns of xe contribute nothing.
    h = jnp.dot(xe, p_ref[W1_R:W1_R + 8, :],
                preferred_element_type=jnp.float32) + p_ref[B1_R:B1_R + 1, :]
    h = jnp.where(h > 0, h, 0.01 * h)
    h = jnp.dot(h, p_ref[W2_R:W2_R + 8, :],
                preferred_element_type=jnp.float32) + p_ref[B2_R:B2_R + 1, :]
    h = jnp.where(h > 0, h, 0.01 * h)                   # (B, 8); col 7 == 0 (pad)

    # ---- fused heads: one matmul -> [ z_mean (4) | z_log_var (4) ]
    heads = jnp.dot(h, p_ref[WH_R:WH_R + 8, :],
                    preferred_element_type=jnp.float32) + p_ref[BH_R:BH_R + 1, :]
    zm = heads[:, 0:LATENT_PAD]                         # (B, 4)
    zlv = heads[:, LATENT_PAD:2 * LATENT_PAD]           # (B, 4)

    # ---- reparameterize: z = mu + eps * exp(log_var / 2)
    enc = zm + eps * jnp.exp(0.5 * zlv)                 # (B, 4); col 3 == 0 (pad)

    # ---- preprocessor: Linear(latent, nq)   (weight cols 4..7 / rows >= 3 are zero pad)
    pre = jnp.dot(enc, p_ref[WP_R:WP_R + LATENT_PAD, :],
                  preferred_element_type=jnp.float32) + p_ref[BP_R:BP_R + 1, :]  # (B, 8)

    # ---- decoder
    # TODO(synk): the real decoder is TorchConnector(qnn) (a qiskit quantum circuit);
    # there is no Pallas equivalent, so we use an exact classical statevector simulation
    # of an RY-product SamplerQNN: P(bitstring) = prod_j P(qubit_j = bit_j).
    cth = jnp.cos(pre)                                  # (B, 8); padded cols give cos(0)=1
    p0 = 0.5 * (1.0 + cth)                              # P(qubit j = 0) = cos^2(theta/2)
    p1 = 0.5 * (1.0 - cth)                              # P(qubit j = 1) = sin^2(theta/2)

    o_ids = jax.lax.broadcasted_iota(jnp.int32, (1, NUM_OUTCOMES), 1)   # (1, 16)
    probs = jnp.ones((xe.shape[0], NUM_OUTCOMES), jnp.float32)
    for j in range(NUM_QUBITS):                         # static, unrolled (nq = 4)
        bit_j = (o_ids >> j) & 1                        # in-kernel bit table (1, 16)
        probs = probs * jnp.where(bit_j > 0, p1[:, j:j + 1], p0[:, j:j + 1])

    # ---- single lane-packed output slab (one write-back DMA)
    out_ref[:, ENC_OFF:ENC_OFF + LATENT_PAD] = enc
    out_ref[:, ZM_OFF:ZM_OFF + LATENT_PAD] = zm
    out_ref[:, ZLV_OFF:ZLV_OFF + LATENT_PAD] = zlv
    out_ref[:, DEC_OFF:DEC_OFF + NUM_OUTCOMES] = probs


def qevae_forward(x, eps, pslab):
    B = x.shape[0]
    # pack x and eps into a single (B, 8) operand
    xe = jnp.zeros((B, XE_COLS), jnp.float32)
    xe = xe.at[:, 0:NUM_QUBITS].set(x)
    xe = xe.at[:, NUM_QUBITS:NUM_QUBITS + LATENT_DIM].set(eps)

    cost = pl.CostEstimate(
        flops=2 * B * (3 * 8 * 8 + LATENT_PAD * 8) + 2 * B * NUM_OUTCOMES * NUM_QUBITS,
        transcendentals=B * (LATENT_PAD + XE_COLS),      # exp + cos
        bytes_accessed=4 * (B * XE_COLS + P_ROWS * P_COLS + B * OUT_COLS),
    )

    out = pl.pallas_call(
        qevae_kernel,
        out_shape=jax.ShapeDtypeStruct((B, OUT_COLS), jnp.float32),
        in_specs=[pl.BlockSpec((B, XE_COLS), lambda: (0, 0)),
                  pl.BlockSpec((P_ROWS, P_COLS), lambda: (0, 0))],
        out_specs=pl.BlockSpec((B, OUT_COLS), lambda: (0, 0)),
        cost_estimate=cost,
    )(xe, pslab)

    encoded = out[:, ENC_OFF:ENC_OFF + LATENT_DIM]
    z_mean = out[:, ZM_OFF:ZM_OFF + LATENT_DIM]
    z_log_var = out[:, ZLV_OFF:ZLV_OFF + LATENT_DIM]
    decoded = out[:, DEC_OFF:DEC_OFF + NUM_OUTCOMES]
    return encoded, z_mean, z_log_var, decoded


def init_params(key):
    """Pack all QeVAE parameters into one (36, 8) f32 slab (single DMA).

    PyTorch Linear weights are (out, in); stored here transposed to (in, out) and
    zero-padded so every block is 8-wide. Row layout:
      rows  0..7  : encoder W1 (in 4 -> out 8), rows 4..7 zero (kills the eps columns)
      rows  8..15 : encoder W2 (in 8 -> out 7), col 7 zero
      rows 16..23 : fused head W = [ z_mean (3) | pad | z_log_var (3) | pad ]
      rows 24..27 : preprocessor W (in 3 -> out 4), cols 4..7 zero
      rows 32..35 : biases b1, b2, [bm | bv], bp
    """
    def torch_linear(k, fan_in, fan_out):
        kw, kb = jax.random.split(k)
        bound = 1.0 / jnp.sqrt(float(fan_in))
        w = jax.random.uniform(kw, (fan_out, fan_in), jnp.float32, -bound, bound)
        b = jax.random.uniform(kb, (fan_out,), jnp.float32, -bound, bound)
        return w.T, b                                    # (in, out), (out,)

    k1, k2, k3, k4, k5 = jax.random.split(key, 5)
    w1, b1 = torch_linear(k1, NUM_QUBITS, HID1)          # (4, 8), (8,)
    w2, b2 = torch_linear(k2, HID1, HID2)                # (8, 7), (7,)
    wm, bm = torch_linear(k3, HID2, LATENT_DIM)          # (7, 3), (3,)
    wv, bv = torch_linear(k4, HID2, LATENT_DIM)          # (7, 3), (3,)
    # preprocessor: normal(0, 0.01) weight, zero bias (as in the PyTorch module)
    wp = (0.01 * jax.random.normal(k5, (NUM_QUBITS, LATENT_DIM), jnp.float32)).T  # (3, 4)
    bp = jnp.zeros((NUM_QUBITS,), jnp.float32)

    p = jnp.zeros((P_ROWS, P_COLS), jnp.float32)
    p = p.at[W1_R:W1_R + NUM_QUBITS, :].set(w1)
    p = p.at[W2_R:W2_R + HID1, 0:HID2].set(w2)
    p = p.at[WH_R:WH_R + HID2, 0:LATENT_DIM].set(wm)
    p = p.at[WH_R:WH_R + HID2, LATENT_PAD:LATENT_PAD + LATENT_DIM].set(wv)
    p = p.at[WP_R:WP_R + LATENT_DIM, 0:NUM_QUBITS].set(wp)
    p = p.at[B1_R, 0:HID1].set(b1)
    p = p.at[B2_R, 0:HID2].set(b2)
    p = p.at[BH_R, 0:LATENT_DIM].set(bm)
    p = p.at[BH_R, LATENT_PAD:LATENT_PAD + LATENT_DIM].set(bv)
    p = p.at[BP_R, 0:NUM_QUBITS].set(bp)
    return p


def qevae_reference(x, eps, p):
    """Pure-JAX reference (unpadded math) for correctness checking."""
    w1 = p[W1_R:W1_R + NUM_QUBITS, :HID1]
    b1 = p[B1_R, :HID1]
    w2 = p[W2_R:W2_R + HID1, :HID2]
    b2 = p[B2_R, :HID2]
    wm = p[WH_R:WH_R + HID2, :LATENT_DIM]
    bm = p[BH_R, :LATENT_DIM]
    wv = p[WH_R:WH_R + HID2, LATENT_PAD:LATENT_PAD + LATENT_DIM]
    bv = p[BH_R, LATENT_PAD:LATENT_PAD + LATENT_DIM]
    wp = p[WP_R:WP_R + LATENT_DIM, :NUM_QUBITS]
    bp = p[BP_R, :NUM_QUBITS]

    leaky = lambda v: jnp.where(v > 0, v, 0.01 * v)
    h = leaky(x @ w1 + b1)
    h = leaky(h @ w2 + b2)
    zm = h @ wm + bm
    zlv = h @ wv + bv
    enc = zm + eps * jnp.exp(0.5 * zlv)
    pre = enc @ wp + bp
    c2 = jnp.cos(0.5 * pre) ** 2
    s2 = jnp.sin(0.5 * pre) ** 2
    bits = ((jnp.arange(NUM_OUTCOMES)[:, None] >> jnp.arange(NUM_QUBITS)[None, :]) & 1
            ).astype(jnp.float32)
    probs = jnp.prod(jnp.where(bits[None] > 0, s2[:, None, :], c2[:, None, :]), axis=-1)
    return enc, zm, zlv, probs


if __name__ == "__main__":
    key = jax.random.PRNGKey(0)
    kx, keps, kp = jax.random.split(key, 3)

    x = jax.random.normal(kx, (BATCH, NUM_QUBITS), jnp.float32)
    # eps corresponds to torch.randn in reparameterize(); generated deterministically
    eps = jax.random.normal(keps, (BATCH, LATENT_DIM), jnp.float32)
    pslab = init_params(kp)

    encoded, z_mean, z_log_var, decoded = qevae_forward(x, eps, pslab)
    jax.block_until_ready((encoded, z_mean, z_log_var, decoded))

    assert encoded.shape == (BATCH, LATENT_DIM)
    assert z_mean.shape == (BATCH, LATENT_DIM)
    assert z_log_var.shape == (BATCH, LATENT_DIM)
    assert decoded.shape == (BATCH, NUM_OUTCOMES)
    # decoder produces a probability distribution per sample (exact by half-angle identity)
    assert bool(jnp.allclose(decoded.sum(axis=-1), 1.0, atol=1e-5))

    # cross-check against the pure-JAX reference
    r_enc, r_zm, r_zlv, r_dec = qevae_reference(x, eps, pslab)
    assert bool(jnp.allclose(encoded, r_enc, atol=1e-3, rtol=1e-3))
    assert bool(jnp.allclose(z_mean, r_zm, atol=1e-3, rtol=1e-3))
    assert bool(jnp.allclose(z_log_var, r_zlv, atol=1e-3, rtol=1e-3))
    assert bool(jnp.allclose(decoded, r_dec, atol=1e-3))

    print("KERNEL_OK")
</pallas_src>

<mosaic_0001>
module attributes {stable_mosaic.version = 11 : i64} {
  func.func @qevae_kernel(%arg0: memref<8x8xf32, #tpu.memory_space<vmem>>, %arg1: memref<36x8xf32, #tpu.memory_space<vmem>>, %arg2: memref<8x28xf32, #tpu.memory_space<vmem>>) attributes {dimension_semantics = [], scalar_prefetch = 0 : i64, scratch_operands = 0 : i64, tpu.core_type = #tpu.core_type<tc>} {
    %c0 = arith.constant 0 : index
    %c0_0 = arith.constant 0 : index
    %0 = vector.load %arg0[%c0, %c0_0] : memref<8x8xf32, #tpu.memory_space<vmem>>, vector<8x8xf32>
    %1 = vector.extract_strided_slice %0 {offsets = [0, 4], sizes = [8, 4], strides = [1, 1]} : vector<8x8xf32> to vector<8x4xf32>
    %c0_1 = arith.constant 0 : index
    %c0_2 = arith.constant 0 : index
    %2 = vector.load %arg1[%c0_1, %c0_2] : memref<36x8xf32, #tpu.memory_space<vmem>>, vector<8x8xf32>
    %cst = arith.constant dense<0.000000e+00> : vector<8x8xf32>
    %3 = tpu.matmul %0, %2, %cst {dimension_numbers = #tpu.dot_dimension_numbers<[1], [0], [0], [1], [0, 0, 1, 1], [], []>} : vector<8x8xf32>, vector<8x8xf32>, vector<8x8xf32> -> vector<8x8xf32>
    %c32 = arith.constant 32 : index
    %c0_3 = arith.constant 0 : index
    %4 = vector.load %arg1[%c32, %c0_3] : memref<36x8xf32, #tpu.memory_space<vmem>>, vector<1x8xf32>
    %5 = vector.broadcast %4 : vector<1x8xf32> to vector<8x8xf32>
    %6 = arith.addf %3, %5 : vector<8x8xf32>
    %cst_4 = arith.constant 0.000000e+00 : f32
    %7 = vector.broadcast %cst_4 : f32 to vector<8x8xf32>
    %8 = arith.cmpf ogt, %6, %7 : vector<8x8xf32>
    %cst_5 = arith.constant 0.00999999977 : f32
    %9 = vector.broadcast %cst_5 : f32 to vector<8x8xf32>
    %10 = arith.mulf %9, %6 : vector<8x8xf32>
    %11 = arith.select %8, %6, %10 : vector<8x8xi1>, vector<8x8xf32>
    %c8 = arith.constant 8 : index
    %c0_6 = arith.constant 0 : index
    %12 = vector.load %arg1[%c8, %c0_6] : memref<36x8xf32, #tpu.memory_space<vmem>>, vector<8x8xf32>
    %cst_7 = arith.constant dense<0.000000e+00> : vector<8x8xf32>
    %13 = tpu.matmul %11, %12, %cst_7 {dimension_numbers = #tpu.dot_dimension_numbers<[1], [0], [0], [1], [0, 0, 1, 1], [], []>} : vector<8x8xf32>, vector<8x8xf32>, vector<8x8xf32> -> vector<8x8xf32>
    %c33 = arith.constant 33 : index
    %c0_8 = arith.constant 0 : index
    %14 = vector.load %arg1[%c33, %c0_8] : memref<36x8xf32, #tpu.memory_space<vmem>>, vector<1x8xf32>
    %15 = vector.broadcast %14 : vector<1x8xf32> to vector<8x8xf32>
    %16 = arith.addf %13, %15 : vector<8x8xf32>
    %cst_9 = arith.constant 0.000000e+00 : f32
    %17 = vector.broadcast %cst_9 : f32 to vector<8x8xf32>
    %18 = arith.cmpf ogt, %16, %17 : vector<8x8xf32>
    %cst_10 = arith.constant 0.00999999977 : f32
    %19 = vector.broadcast %cst_10 : f32 to vector<8x8xf32>
    %20 = arith.mulf %19, %16 : vector<8x8xf32>
    %21 = arith.select %18, %16, %20 : vector<8x8xi1>, vector<8x8xf32>
    %c16 = arith.constant 16 : index
    %c0_11 = arith.constant 0 : index
    %22 = vector.load %arg1[%c16, %c0_11] : memref<36x8xf32, #tpu.memory_space<vmem>>, vector<8x8xf32>
    %cst_12 = arith.constant dense<0.000000e+00> : vector<8x8xf32>
    %23 = tpu.matmul %21, %22, %cst_12 {dimension_numbers = #tpu.dot_dimension_numbers<[1], [0], [0], [1], [0, 0, 1, 1], [], []>} : vector<8x8xf32>, vector<8x8xf32>, vector<8x8xf32> -> vector<8x8xf32>
    %c34 = arith.constant 34 : index
    %c0_13 = arith.constant 0 : index
    %24 = vector.load %arg1[%c34, %c0_13] : memref<36x8xf32, #tpu.memory_space<vmem>>, vector<1x8xf32>
    %25 = vector.broadcast %24 : vector<1x8xf32> to vector<8x8xf32>
    %26 = arith.addf %23, %25 : vector<8x8xf32>
    %27 = vector.extract_strided_slice %26 {offsets = [0, 0], sizes = [8, 4], strides = [1, 1]} : vector<8x8xf32> to vector<8x4xf32>
    %28 = vector.extract_strided_slice %26 {offsets = [0, 4], sizes = [8, 4], strides = [1, 1]} : vector<8x8xf32> to vector<8x4xf32>
    %cst_14 = arith.constant 5.000000e-01 : f32
    %29 = vector.broadcast %cst_14 : f32 to vector<8x4xf32>
    %30 = arith.mulf %29, %28 : vector<8x4xf32>
    %31 = math.exp %30 : vector<8x4xf32>
    %32 = arith.mulf %1, %31 : vector<8x4xf32>
    %33 = arith.addf %27, %32 : vector<8x4xf32>
    %c24 = arith.constant 24 : index
    %c0_15 = arith.constant 0 : index
    %34 = vector.load %arg1[%c24, %c0_15] : memref<36x8xf32, #tpu.memory_space<vmem>>, vector<4x8xf32>
    %cst_16 = arith.constant dense<0.000000e+00> : vector<8x8xf32>
    %35 = tpu.matmul %33, %34, %cst_16 {dimension_numbers = #tpu.dot_dimension_numbers<[1], [0], [0], [1], [0, 0, 1, 1], [], []>} : vector<8x4xf32>, vector<4x8xf32>, vector<8x8xf32> -> vector<8x8xf32>
    %c35 = arith.constant 35 : index
    %c0_17 = arith.constant 0 : index
    %36 = vector.load %arg1[%c35, %c0_17] : memref<36x8xf32, #tpu.memory_space<vmem>>, vector<1x8xf32>
    %37 = vector.broadcast %36 : vector<1x8xf32> to vector<8x8xf32>
    %38 = arith.addf %35, %37 : vector<8x8xf32>
    %39 = math.cos %38 : vector<8x8xf32>
    %cst_18 = arith.constant 1.000000e+00 : f32
    %40 = vector.broadcast %cst_18 : f32 to vector<8x8xf32>
    %41 = arith.addf %40, %39 : vector<8x8xf32>
    %cst_19 = arith.constant 5.000000e-01 : f32
    %42 = vector.broadcast %cst_19 : f32 to vector<8x8xf32>
    %43 = arith.mulf %42, %41 : vector<8x8xf32>
    %cst_20 = arith.constant 1.000000e+00 : f32
    %44 = vector.broadcast %cst_20 : f32 to vector<8x8xf32>
    %45 = arith.subf %44, %39 : vector<8x8xf32>
    %cst_21 = arith.constant 5.000000e-01 : f32
    %46 = vector.broadcast %cst_21 : f32 to vector<8x8xf32>
    %47 = arith.mulf %46, %45 : vector<8x8xf32>
    %48 = tpu.iota {dimensions = array<i32: 1>} : vector<1x16xi32>
    %cst_22 = arith.constant 1.000000e+00 : f32
    %49 = vector.broadcast %cst_22 : f32 to vector<8x16xf32>
    %c0_i32 = arith.constant 0 : i32
    %50 = vector.broadcast %c0_i32 : i32 to vector<1x16xi32>
    %51 = arith.shrsi %48, %50 : vector<1x16xi32>
    %c1_i32 = arith.constant 1 : i32
    %52 = vector.broadcast %c1_i32 : i32 to vector<1x16xi32>
    %53 = arith.andi %51, %52 : vector<1x16xi32>
    %c0_i32_23 = arith.constant 0 : i32
    %54 = vector.broadcast %c0_i32_23 : i32 to vector<1x16xi32>
    %55 = arith.cmpi sgt, %53, %54 : vector<1x16xi32>
    %56 = vector.extract_strided_slice %47 {offsets = [0, 0], sizes = [8, 1], strides = [1, 1]} : vector<8x8xf32> to vector<8x1xf32>
    %57 = vector.extract_strided_slice %43 {offsets = [0, 0], sizes = [8, 1], strides = [1, 1]} : vector<8x8xf32> to vector<8x1xf32>
    %58 = vector.shape_cast %55 : vector<1x16xi1> to vector<1x16xi1>
    %59 = vector.broadcast %58 : vector<1x16xi1> to vector<8x16xi1>
    %60 = vector.shape_cast %56 : vector<8x1xf32> to vector<8x1xf32>
    %61 = vector.broadcast %60 : vector<8x1xf32> to vector<8x16xf32>
    %62 = vector.shape_cast %57 : vector<8x1xf32> to vector<8x1xf32>
    %63 = vector.broadcast %62 : vector<8x1xf32> to vector<8x16xf32>
    %64 = arith.select %59, %61, %63 : vector<8x16xi1>, vector<8x16xf32>
    %65 = arith.mulf %49, %64 : vector<8x16xf32>
    %c1_i32_24 = arith.constant 1 : i32
    %66 = vector.broadcast %c1_i32_24 : i32 to vector<1x16xi32>
    %67 = arith.shrsi %48, %66 : vector<1x16xi32>
    %c1_i32_25 = arith.constant 1 : i32
    %68 = vector.broadcast %c1_i32_25 : i32 to vector<1x16xi32>
    %69 = arith.andi %67, %68 : vector<1x16xi32>
    %c0_i32_26 = arith.constant 0 : i32
    %70 = vector.broadcast %c0_i32_26 : i32 to vector<1x16xi32>
    %71 = arith.cmpi sgt, %69, %70 : vector<1x16xi32>
    %72 = vector.extract_strided_slice %47 {offsets = [0, 1], sizes = [8, 1], strides = [1, 1]} : vector<8x8xf32> to vector<8x1xf32>
    %73 = vector.extract_strided_slice %43 {offsets = [0, 1], sizes = [8, 1], strides = [1, 1]} : vector<8x8xf32> to vector<8x1xf32>
    %74 = vector.shape_cast %71 : vector<1x16xi1> to vector<1x16xi1>
    %75 = vector.broadcast %74 : vector<1x16xi1> to vector<8x16xi1>
    %76 = vector.shape_cast %72 : vector<8x1xf32> to vector<8x1xf32>
    %77 = vector.broadcast %76 : vector<8x1xf32> to vector<8x16xf32>
    %78 = vector.shape_cast %73 : vector<8x1xf32> to vector<8x1xf32>
    %79 = vector.broadcast %78 : vector<8x1xf32> to vector<8x16xf32>
    %80 = arith.select %75, %77, %79 : vector<8x16xi1>, vector<8x16xf32>
    %81 = arith.mulf %65, %80 : vector<8x16xf32>
    %c2_i32 = arith.constant 2 : i32
    %82 = vector.broadcast %c2_i32 : i32 to vector<1x16xi32>
    %83 = arith.shrsi %48, %82 : vector<1x16xi32>
    %c1_i32_27 = arith.constant 1 : i32
    %84 = vector.broadcast %c1_i32_27 : i32 to vector<1x16xi32>
    %85 = arith.andi %83, %84 : vector<1x16xi32>
    %c0_i32_28 = arith.constant 0 : i32
    %86 = vector.broadcast %c0_i32_28 : i32 to vector<1x16xi32>
    %87 = arith.cmpi sgt, %85, %86 : vector<1x16xi32>
    %88 = vector.extract_strided_slice %47 {offsets = [0, 2], sizes = [8, 1], strides = [1, 1]} : vector<8x8xf32> to vector<8x1xf32>
    %89 = vector.extract_strided_slice %43 {offsets = [0, 2], sizes = [8, 1], strides = [1, 1]} : vector<8x8xf32> to vector<8x1xf32>
    %90 = vector.shape_cast %87 : vector<1x16xi1> to vector<1x16xi1>
    %91 = vector.broadcast %90 : vector<1x16xi1> to vector<8x16xi1>
    %92 = vector.shape_cast %88 : vector<8x1xf32> to vector<8x1xf32>
    %93 = vector.broadcast %92 : vector<8x1xf32> to vector<8x16xf32>
    %94 = vector.shape_cast %89 : vector<8x1xf32> to vector<8x1xf32>
    %95 = vector.broadcast %94 : vector<8x1xf32> to vector<8x16xf32>
    %96 = arith.select %91, %93, %95 : vector<8x16xi1>, vector<8x16xf32>
    %97 = arith.mulf %81, %96 : vector<8x16xf32>
    %c3_i32 = arith.constant 3 : i32
    %98 = vector.broadcast %c3_i32 : i32 to vector<1x16xi32>
    %99 = arith.shrsi %48, %98 : vector<1x16xi32>
    %c1_i32_29 = arith.constant 1 : i32
    %100 = vector.broadcast %c1_i32_29 : i32 to vector<1x16xi32>
    %101 = arith.andi %99, %100 : vector<1x16xi32>
    %c0_i32_30 = arith.constant 0 : i32
    %102 = vector.broadcast %c0_i32_30 : i32 to vector<1x16xi32>
    %103 = arith.cmpi sgt, %101, %102 : vector<1x16xi32>
    %104 = vector.extract_strided_slice %47 {offsets = [0, 3], sizes = [8, 1], strides = [1, 1]} : vector<8x8xf32> to vector<8x1xf32>
    %105 = vector.extract_strided_slice %43 {offsets = [0, 3], sizes = [8, 1], strides = [1, 1]} : vector<8x8xf32> to vector<8x1xf32>
    %106 = vector.shape_cast %103 : vector<1x16xi1> to vector<1x16xi1>
    %107 = vector.broadcast %106 : vector<1x16xi1> to vector<8x16xi1>
    %108 = vector.shape_cast %104 : vector<8x1xf32> to vector<8x1xf32>
    %109 = vector.broadcast %108 : vector<8x1xf32> to vector<8x16xf32>
    %110 = vector.shape_cast %105 : vector<8x1xf32> to vector<8x1xf32>
    %111 = vector.broadcast %110 : vector<8x1xf32> to vector<8x16xf32>
    %112 = arith.select %107, %109, %111 : vector<8x16xi1>, vector<8x16xf32>
    %113 = arith.mulf %97, %112 : vector<8x16xf32>
    %c0_31 = arith.constant 0 : index
    %c0_32 = arith.constant 0 : index
    %114 = vector.load %arg2[%c0_31, %c0_32] : memref<8x28xf32, #tpu.memory_space<vmem>>, vector<8x4xf32>
    tpu.vector_store %arg2[%c0_31, %c0_32], %33 {strides = array<i32>} : memref<8x28xf32, #tpu.memory_space<vmem>>, vector<8x4xf32>,
    %c0_33 = arith.constant 0 : index
    %c4 = arith.constant 4 : index
    %115 = vector.load %arg2[%c0_33, %c4] : memref<8x28xf32, #tpu.memory_space<vmem>>, vector<8x4xf32>
    tpu.vector_store %arg2[%c0_33, %c4], %27 {strides = array<i32>} : memref<8x28xf32, #tpu.memory_space<vmem>>, vector<8x4xf32>,
    %c0_34 = arith.constant 0 : index
    %c8_35 = arith.constant 8 : index
    %116 = vector.load %arg2[%c0_34, %c8_35] : memref<8x28xf32, #tpu.memory_space<vmem>>, vector<8x4xf32>
    tpu.vector_store %arg2[%c0_34, %c8_35], %28 {strides = array<i32>} : memref<8x28xf32, #tpu.memory_space<vmem>>, vector<8x4xf32>,
    %c0_36 = arith.constant 0 : index
    %c12 = arith.constant 12 : index
    %117 = vector.load %arg2[%c0_36, %c12] : memref<8x28xf32, #tpu.memory_space<vmem>>, vector<8x16xf32>
    tpu.vector_store %arg2[%c0_36, %c12], %113 {strides = array<i32>} : memref<8x28xf32, #tpu.memory_space<vmem>>, vector<8x16xf32>,
    return
  }
}

</mosaic_0001>

<bundles_post_ra>
// kernel: tpu_custom_call.1
= control target key start
LH: loop header
LB: loop body
LE: loop exit
PB: predicated region body
PF: predicated region fallthrough
CT: control target
= control target key end

     0   :  { %vm16_vm0 = vcmask 64512   ;;  %s590_s0 = inlined_call_operand.vmem [shape: f32[8,8], index: 0, kind: input, shape index: {}]   ;;  %s591_s1 = inlined_call_operand.vmem [shape: f32[36,8], index: 1, kind: input, shape index: {}]   ;;  %s592_s2 = inlined_call_operand.hbm [shape: f32[8,28], index: 2, kind: output, shape index: {}]  }
   0x1   :  { %v13_v0 = vld [vmem:[%s591_s1] sm:$0xff] }
   0x2   :  { %v12_v1 = vld [vmem:[%s590_s0] sm:$0xff]  ;;  %35 = vmatpush.msra.mxu0 %v13_v0 }
   0x3   :  { %389 = vmatmul.msk.f32.vlgmr.msra.gmra.mxu0 %vm16_vm0, %v12_v1 }
   0x4   :  { %7 = vsyncpa [#allocation3], 0  ;;  %v43_v2 = vld [vmem:[%s591_s1 + $0x8] sm:$0xff]  ;;  %v419_v3 = vld [vmem:[%s591_s1 + $0x20] ss:$0 sm:$0xff]  ;;  %s451_s22 = smov 124  }
   0x5   :  { %64 = vmatpush.msra.mxu1 %v43_v2  ;;  %v72_v8 = vld [vmem:[%s591_s1 + $0x10] sm:$0xff]  ;;  %v420_v9 = vld [vmem:[%s591_s1 + $0x21] ss:$0 sm:$0xff]  ;;  %v421_v14 = vld [vmem:[%s591_s1 + $0x22] ss:$0 sm:$0xff]  ;;  %vm114_vm3 = vcmask 1043456  }
   0x6   :  { %93 = vmatpush.msra.mxu2 %v72_v8  ;;  %v107_v21 = vld [vmem:[%s591_s1 + $0x18] sm:$0xf]  ;;  %vm110_vm4 = vcmask 31744   ;;  %v452_v24 = vmov 1   ;;  %v453_v25 = vmov 0   ;;  %s463_s27 = smov 12  }
   0x7   :  { %392 = vmatpush.msk.msra.mxu3 %vm114_vm3, %v107_v21  ;;  %414 = vset.pattern.permute.xlu2 %v452_v24  ;;  %v422_v26 = vld [vmem:[%s591_s1 + $0x23] ss:$0 sm:$0xff]  ;;  %v454_v40 = vmov 683565275   ;;  %v455_v42 = vmov 2475754826  }
   0x8   :  { %412 = vset.pattern.permute.xlu1 %v453_v25  ;;  %411 = vset.pattern.permute.xlu0 %v453_v25  ;;  %v456_v45 = vmov 2131351028   ;;  %v457_v48 = vmov 2102212464   ;;  %v458_v51 = vmov 920167782  }
   0x9   :  { %v459_v54 = vmov 1326507024   ;;  %s462_s1 = smov 4   ;;  %s464_s28 = smov [#allocation2]  }
   0xa   :  { %s378_s29 = sshll.u32 %s464_s28, 4  ;;  %s380_s4 = sshll.u32 %s592_s2, 4  ;;  %s379_s29 = int_to_ptr.vmem [resolvable:$true] %s378_s29  ;;  %s381_s4 = int_to_ptr.hbm [resolvable:$true] %s380_s4 }
  0x80   :  { %v37_v4 = vpop.f32.mrf.mxu0 }
  0x81   :  { %v38_v5 = vadd.f32 %v419_v3, %v37_v4 }
  0x83   :  { %v41_v6 = vmul.f32 0.01, %v38_v5  ;;  %vm40_vm1 = vcmp.gt.f32.partialorder %v38_v5, 0.0 }
  0x85   :  { %v42_v7 = vsel %vm40_vm1, %v38_v5, %v41_v6 }
  0x86   :  { %390 = vmatmul.msk.f32.vlgmr.msra.gmra.mxu1 %vm16_vm0, %v42_v7 }
 0x103   :  { %v66_v10 = vpop.f32.mrf.mxu1 }
 0x104   :  { %v67_v11 = vadd.f32 %v420_v9, %v66_v10 }
 0x106   :  { %v70_v12 = vmul.f32 0.01, %v67_v11  ;;  %vm69_vm2 = vcmp.gt.f32.partialorder %v67_v11, 0.0 }
 0x108   :  { %v71_v13 = vsel %vm69_vm2, %v67_v11, %v70_v12 }
 0x109   :  { %391 = vmatmul.msk.f32.vlgmr.msra.gmra.mxu2 %vm16_vm0, %v71_v13 }
 0x18c   :  { %v95_v15 = vpop.f32.mrf.mxu2 }
 0x18d   :  { %v504_v16 = vadd.f32 %v421_v14, %v95_v15 }
 0x18f   :  { %v98_v17 = vmul.f32 0.5, %v504_v16 }
 0x191   :  { %v99_v18 = vmul.f32 1.442695, %v98_v17 }
 0x193   :  { %423 = vpow2.f32 %v99_v18 }
 0x199   :  { %v424_v19 = vpop.eup %423 }
 0x19a   :  { %v101_v20 = vmul.f32 %v424_v19, %v12_v1 }
 0x19c   :  { %103 = vrot.lane.b32.xlu0 %v101_v20, %s451_s22 }
 0x20e   :  { %v104_v22 = vpop.permute.xlu0 %103 }
 0x20f   :  { %v106_v23 = vadd.f32 %v104_v22, %v504_v16 }
 0x211   :  { %393 = vmatmul.msk.f32.vlgmr.msra.gmra.mxu3 %vm110_vm4, %v106_v23  ;;  %358 = vst.msk [vmem:[#allocation2] sm:$0xff] %vm110_vm4, %v106_v23 }
 0x294   :  { %v135_v27 = vpop.f32.mrf.mxu3 }
 0x295   :  { %v517_v28 = vadd.f32 %v422_v26, %v135_v27 }
 0x297   :  { %v141_v29 = vand.u32 2139095040, %v517_v28  ;;  %v138_v32 = vand.u32 2147483647, %v517_v28  ;;  %vm140_vm1 = vcmp.lt.s32.totalorder %v517_v28, 0 }
 0x299   :  { %v142_v30 = vshrl.u32 %v141_v29, 23  ;;  %v145_v34 = vand.u32 8388607, %v138_v32  ;;  %vm575_vm2 = vcmp.le.f32.partialorder %v138_v32, 0.7853982 }
 0x29b   :  { %v394_v31 = vadd.s32 4294967169, %v142_v30  ;;  %v146_v38 = vor.u32 8388608, %v145_v34 }
 0x29d   :  { %v148_v33 = vadd.s32 1, %v394_v31  ;;  %v534_v61 = vshll.u32 %v146_v38, 8 }
 0x29f   :  { %vm149_vm5 = vcmp.gt.s32.totalorder %v148_v33, 0  ;;  %v187_v4 = vand.u32 65535, %v534_v61  ;;  %v188_v5 = vshrl.u32 %v534_v61, 16 }
 0x2a0   :  { %v150_v35 = vsel %vm149_vm5, %v148_v33, 0 }
 0x2a1   :  { %v152_v36 = vand.u32 31, %v150_v35  ;;  %v525_v39 = vshrl.u32 %v150_v35, 5 }
 0x2a3   :  { %v523_v37 = vsub.s32 32, %v152_v36  ;;  %v155_v41 = vshll.u32 %v454_v40, %v152_v36  ;;  %v158_v43 = vshll.u32 %v455_v42, %v152_v36  ;;  %v161_v47 = vshll.u32 %v456_v45, %v152_v36 }
 0x2a4   :  { %v164_v50 = vshll.u32 %v457_v48, %v152_v36  ;;  %v167_v53 = vshll.u32 %v458_v51, %v152_v36  ;;  %vm170_vm6 = vcmp.lt.s32.totalorder %v525_v39, 1  ;;  %vm173_vm7 = vcmp.lt.s32.totalorder %v525_v39, 4 }
 0x2a5   :  { %v156_v44 = vshrl.u32 %v455_v42, %v523_v37  ;;  %v159_v46 = vshrl.u32 %v456_v45, %v523_v37  ;;  %v162_v49 = vshrl.u32 %v457_v48, %v523_v37  ;;  %v165_v52 = vshrl.u32 %v458_v51, %v523_v37 }
 0x2a6   :  { %v168_v55 = vshrl.u32 %v459_v54, %v523_v37  ;;  %vm172_vm8 = vcmp.lt.s32.totalorder %v525_v39, 3  ;;  %vm171_vm9 = vcmp.lt.s32.totalorder %v525_v39, 2  ;;  %v154_v38 = vshrl.u32 %v454_v40, %v523_v37 }
 0x2a7   :  { %v157_v56 = vor.u32 %v156_v44, %v155_v41  ;;  %v160_v57 = vor.u32 %v159_v46, %v158_v43  ;;  %v163_v58 = vor.u32 %v162_v49, %v161_v47  ;;  %v166_v59 = vor.u32 %v165_v52, %v164_v50 }
 0x2a8   :  { %v169_v60 = vor.u32 %v168_v55, %v167_v53 }
 0x2a9   :  { %v178_v62 = vsel %vm170_vm6, %v157_v56, %v160_v57  ;;  %v182_v63 = vsel %vm170_vm6, %v160_v57, %v163_v58  ;;  %v179_v0 = vsel %vm173_vm7, %v166_v59, 920167782  ;;  %v175_v34 = vsel %vm173_vm7, %v163_v58, 2102212464 }
 0x2aa   :  { %v183_v1 = vsel %vm173_vm7, %v169_v60, 1326507024  ;;  %v180_v2 = vsel %vm172_vm8, %v163_v58, %v179_v0  ;;  %v174_v46 = vsel %vm170_vm6, %v154_v38, %v157_v56  ;;  %v176_v47 = vsel %vm172_vm8, %v160_v57, %v175_v34 }
 0x2ab   :  { %v184_v3 = vsel %vm172_vm8, %v166_v59, %v183_v1  ;;  %v181_v6 = vsel %vm171_vm9, %v178_v62, %v180_v2  ;;  %v177_v37 = vsel %vm171_vm9, %v174_v46, %v176_v47  ;;  %vm281_vm6 = vweird.f32 %v517_v28 }
 0x2ac   :  { %v185_v7 = vsel %vm171_vm9, %v182_v63, %v184_v3  ;;  %v211_v10 = vand.u32 65535, %v181_v6  ;;  %v212_v11 = vshrl.u32 %v181_v6, 16  ;;  %v231_v54 = vmul.u32 %v534_v61, %v177_v37 }
 0x2ad   :  { %v189_v8 = vand.u32 65535, %v185_v7  ;;  %v190_v9 = vshrl.u32 %v185_v7, 16 }
 0x2ae   :  { %v214_v14 = vmul.u32 %v212_v11, %v187_v4  ;;  %v215_v15 = vmul.u32 %v211_v10, %v188_v5  ;;  %v213_v20 = vmul.u32 %v211_v10, %v187_v4  ;;  %v216_v26 = vmul.u32 %v212_v11, %v188_v5 }
 0x2af   :  { %v192_v12 = vmul.u32 %v190_v9, %v187_v4  ;;  %v193_v13 = vmul.u32 %v189_v8, %v188_v5  ;;  %v191_v17 = vmul.u32 %v189_v8, %v187_v4  ;;  %v194_v19 = vmul.u32 %v190_v9, %v188_v5 }
 0x2b0   :  { %v217_v21 = vshll.u32 %v214_v14, 16  ;;  %v219_v29 = vshll.u32 %v215_v15, 16  ;;  %v218_v44 = vshrl.u32 %v214_v14, 16  ;;  %v220_v50 = vshrl.u32 %v215_v15, 16 }
 0x2b1   :  { %v195_v18 = vshll.u32 %v192_v12, 16  ;;  %v197_v22 = vshll.u32 %v193_v13, 16  ;;  %v196_v41 = vshrl.u32 %v192_v12, 16  ;;  %v198_v48 = vshrl.u32 %v193_v13, 16 }
 0x2b2   :  { %vm221_vm11 = vc.u32 %v213_v20, %v217_v21  ;;  %v223_v30 = vadd.s32 %v217_v21, %v213_v20 }
 0x2b3   :  { %vm199_vm10 = vc.u32 %v191_v17, %v195_v18  ;;  %v201_v23 = vadd.s32 %v195_v18, %v191_v17  ;;  %v222_v33 = vsel %vm221_vm11, 1, %v453_v25  ;;  %vm363_vm11 = vcmask 64544  }
 0x2b4   :  { %v200_v27 = vsel %vm199_vm10, 1, %v453_v25  ;;  %v224_v36 = vadd.s32 %v222_v33, %v216_v26  ;;  %vm225_vm13 = vc.u32 %v223_v30, %v219_v29  ;;  %v227_v53 = vadd.s32 %v223_v30, %v219_v29 }
 0x2b5   :  { %v202_v31 = vadd.s32 %v200_v27, %v194_v19  ;;  %vm203_vm12 = vc.u32 %v201_v23, %v197_v22  ;;  %v226_v43 = vsel %vm225_vm13, 1, %v453_v25  ;;  %vm371_vm13 = vcmask 228448  }
 0x2b6   :  { %v204_v35 = vsel %vm203_vm12, 1, %v453_v25  ;;  %v228_v45 = vadd.s32 %v226_v43, %v224_v36  ;;  %vm365_vm12 = vcmask 97344  }
 0x2b7   :  { %v206_v42 = vadd.s32 %v204_v35, %v202_v31 }
 0x2b8   :  { %v229_v51 = vadd.s32 %v228_v45, %v218_v44 }
 0x2b9   :  { %v207_v49 = vadd.s32 %v206_v42, %v196_v41 }
 0x2ba   :  { %v230_v40 = vadd.s32 %v229_v51, %v220_v50 }
 0x2bb   :  { %v208_v52 = vadd.s32 %v207_v49, %v198_v48 }
 0x2bc   :  { %v234_v25 = vadd.s32 1, %v230_v40 }
 0x2bd   :  { %vm233_vm14 = vc.u32 %v208_v52, %v227_v53  ;;  %v232_v39 = vadd.s32 %v227_v53, %v208_v52  ;;  %v460_v52 = vmov 3   ;;  %v461_v53 = vmov 2  }
 0x2be   :  { %v235_v55 = vsel %vm233_vm14, %v234_v25, %v230_v40 }
 0x2bf   :  { %v236_v58 = vadd.s32 %v235_v55, %v231_v54 }
 0x2c1   :  { %v237_v56 = vadd.s32 536870912, %v236_v58 }
 0x2c3   :  { %v238_v59 = vshrl.u32 %v237_v56, 30 }
 0x2c5   :  { %v239_v60 = vshll.u32 %v238_v59, 30  ;;  %v262_v21 = vsub.s32 4, %v238_v59 }
 0x2c7   :  { %v240_v57 = vsub.s32 %v236_v58, %v239_v60  ;;  %v263_v29 = vsel %vm140_vm1, %v262_v21, %v238_v59 }
 0x2c8   :  { %v265_v32 = vsel %vm575_vm2, 0, %v263_v29 }
 0x2c9   :  { %vm241_vm15 = vcmp.lt.s32.totalorder %v240_v57, 0  ;;  %v242_v62 = vsub.s32 0, %v240_v57  ;;  %v282_v38 = vand.u32 3, %v265_v32 }
 0x2cb   :  { %v243_v63 = vsel %vm241_vm15, %v242_v62, %v240_v57  ;;  %vm284_vm3 = vcmp.eq.s32.totalorder %v282_v38, 0  ;;  %vm287_vm4 = vcmp.eq.s32.totalorder %v282_v38, 2  ;;  %vm283_vm5 = vcmp.lt.s32.totalorder %v282_v38, 2 }
 0x2cc   :  { %v244_v0 = vclz %v243_v63 }
 0x2ce   :  { %v395_v1 = vadd.s32 4294967294, %v244_v0 }
 0x2d0   :  { %vm396_vm0 = vcmp.lt.s32.totalorder %v395_v1, 0 }
 0x2d1   :  { %v247_v2 = vsel %vm396_vm0, 0, %v395_v1 }
 0x2d2   :  { %v248_v3 = vsub.s32 32, %v247_v2  ;;  %v252_v4 = vsub.s32 4294967266, %v247_v2  ;;  %v249_v5 = vshll.u32 %v240_v57, %v247_v2 }
 0x2d4   :  { %v250_v6 = vshrl.u32 %v232_v39, %v248_v3  ;;  %v253_v7 = vadd.s32 127, %v252_v4 }
 0x2d6   :  { %v251_v61 = vor.u32 %v250_v6, %v249_v5  ;;  %v254_v8 = vshll.u32 %v253_v7, 23 }
 0x2d8   :  { %v255_v9 = vor.u32 4788187, %v254_v8  ;;  %v258_v11 = vcvt.s32.f32 %v251_v61 }
 0x2da   :  { %v256_v10 = vand.u32 2147483647, %v255_v9 }
 0x2dc   :  { %v259_v12 = vmul.f32 %v258_v11, %v256_v10 }
 0x2de   :  { %v260_v13 = vxor.u32 2147483648, %v259_v12 }
 0x2e0   :  { %v261_v15 = vsel %vm140_vm1, %v260_v13, %v259_v12 }
 0x2e1   :  { %v264_v17 = vsel %vm575_vm2, %v517_v28, %v261_v15  ;;  %v296_v28 = vlaneseq }
 0x2e2   :  { %v266_v18 = vmul.f32 %v264_v17, %v264_v17 }
 0x2e3   :  { %v297_v25 = vand.u32 127, %v296_v28 }
 0x2e4   :  { %v267_v19 = vmul.f32 -0.001358992, %v266_v18  ;;  %v274_v20 = vmul.f32 -0.00019511016, %v266_v18 }
 0x2e5   :  { %v313_v54 = vshra.s32 %v297_v25, 1  ;;  %v328_v56 = vshra.s32 %v297_v25, 2  ;;  %v298_v60 = vand.u32 1, %v297_v25  ;;  %v343_v57 = vshra.s32 %v297_v25, 3 }
 0x2e6   :  { %v268_v22 = vadd.f32 0.041655596, %v267_v19  ;;  %v275_v23 = vadd.f32 0.008332121, %v274_v20 }
 0x2e7   :  { %v314_v58 = vand.u32 1, %v313_v54  ;;  %v329_v62 = vand.u32 1, %v328_v56  ;;  %vm299_vm8 = vcmp.gt.s32.totalorder %v298_v60, 0  ;;  %v344_v63 = vand.u32 1, %v343_v57 }
 0x2e8   :  { %v269_v26 = vmul.f32 %v268_v22, %v266_v18  ;;  %v276_v27 = vmul.f32 %v275_v23, %v266_v18 }
 0x2e9   :  { %vm315_vm7 = vcmp.gt.s32.totalorder %v314_v58, 0  ;;  %vm330_vm9 = vcmp.gt.s32.totalorder %v329_v62, 0  ;;  %vm345_vm10 = vcmp.gt.s32.totalorder %v344_v63, 0 }
 0x2ea   :  { %v270_v30 = vadd.f32 -0.4999988, %v269_v26  ;;  %v277_v31 = vadd.f32 -0.16666654, %v276_v27 }
 0x2ec   :  { %v271_v33 = vmul.f32 %v270_v30, %v266_v18  ;;  %v278_v34 = vmul.f32 %v277_v31, %v266_v18 }
 0x2ee   :  { %v272_v35 = vadd.f32 1.0, %v271_v33  ;;  %v279_v36 = vadd.f32 1.0, %v278_v34 }
 0x2f0   :  { %v280_v41 = vmul.f32 %v279_v36, %v264_v17  ;;  %v288_v42 = vxor.u32 2147483648, %v272_v35 }
 0x2f2   :  { %v285_v43 = vxor.u32 2147483648, %v280_v41  ;;  %v289_v45 = vsel %vm287_vm4, %v288_v42, %v280_v41 }
 0x2f4   :  { %v286_v44 = vsel %vm284_vm3, %v272_v35, %v285_v43 }
 0x2f5   :  { %v290_v46 = vsel %vm283_vm5, %v286_v44, %v289_v45 }
 0x2f6   :  { %v291_v47 = vsel %vm281_vm6, nan, %v290_v46 }
 0x2f7   :  { %v294_v48 = vsub.f32 1.0, %v291_v47  ;;  %v292_v49 = vadd.f32 1.0, %v291_v47 }
 0x2f9   :  { %v295_v50 = vmul.f32 0.5, %v294_v48  ;;  %v293_v51 = vmul.f32 0.5, %v292_v49 }
 0x2fb   :  { %304 = vperm.xlu0 %411, %v295_v50   ;;  %323 = vperm.xlu2 %414, %v293_v51  }
 0x2fc   :  { %309 = vperm.xlu1 %412, %v293_v51  }
 0x303   :  { %418 = vset.pattern.permute.xlu0 %v460_v52  ;;  %415 = vset.pattern.permute.xlu2 %v461_v53 }
 0x304   :  { %413 = vset.pattern.permute.xlu1 %v452_v24  ;;  %353 = vperm.xlu0 %418, %v293_v51  }
 0x305   :  { %334 = vperm.xlu2 %415, %v295_v50   ;;  %319 = vperm.xlu1 %413, %v295_v50  }
 0x30d   :  { %417 = vset.pattern.permute.xlu2 %v460_v52  ;;  %416 = vset.pattern.permute.xlu1 %v461_v53 }
 0x30e   :  { %349 = vperm.xlu2 %417, %v295_v50   ;;  %338 = vperm.xlu1 %416, %v293_v51  }
 0x316   :  { %360 = vrot.lane.b32.xlu1 %v504_v16, %s462_s1 }
 0x355   :  { %v324_v37 = vpop.permute.xlu2 %323 }
 0x35f   :  { %v335_v24 = vpop.permute.xlu2 %334 }
 0x368   :  { %v350_v4 = vpop.permute.xlu2 %349 }
 0x36d   :  { %v305_v55 = vpop.permute.xlu0 %304 }
 0x36e   :  { %v310_v40 = vpop.permute.xlu1 %309 }
 0x36f   :  { %v312_v1 = vsel %vm299_vm8, %v305_v55, %v310_v40 }
 0x376   :  { %v354_v16 = vpop.permute.xlu0 %353 }
 0x377   :  { %v320_v59 = vpop.permute.xlu1 %319  ;;  %v356_v6 = vsel %vm345_vm10, %v350_v4, %v354_v16 }
 0x378   :  { %v326_v0 = vsel %vm315_vm7, %v320_v59, %v324_v37 }
 0x379   :  { %v327_v2 = vmul.f32 %v326_v0, %v312_v1 }
 0x380   :  { %v339_v39 = vpop.permute.xlu1 %338 }
 0x381   :  { %v341_v3 = vsel %vm330_vm9, %v335_v24, %v339_v39 }
 0x382   :  { %v342_v5 = vmul.f32 %v341_v3, %v327_v2 }
 0x384   :  { %v357_v7 = vmul.f32 %v356_v6, %v342_v5 }
 0x386   :  { %368 = vrot.lane.b32.xlu2 %v357_v7, %s463_s27 }
 0x388   :  { %v361_v61 = vpop.permute.xlu1 %360 }
 0x389   :  { %364 = vst.msk [vmem:[#allocation2] sm:$0xff] %vm363_vm11, %v361_v61 }
 0x38a   :  { %366 = vst.msk [vmem:[#allocation2] sm:$0xff] %vm365_vm12, %v361_v61 }
 0x3e0   :  { %v369_v8 = vpop.permute.xlu2 %368 }
 0x3e1   :  { %372 = vst.msk [vmem:[#allocation2] sm:$0xff] %vm371_vm13, %v369_v8 }
 0x3e2   :  { %383 = dma.vmem_to_hbm [thread:$0]  %s379_s29, 128, %s381_s4, [#allocation3]  }
 0x3e3   :  { %449 = dma.done.wait [#allocation3], 128  }
 0x3e4   :  { %450 = vsyncadd [#allocation3], 4294967168 }
 0x3e5   :  { %388 = vsyncpa [#allocation3], 1 }

</bundles_post_ra>
